<compile_context>
chip_gen: v7x
topology: tpu7x:2x2x1
jax: 0.10.0
libtpu: 0.0.40
codegen_flags: <defaults>
</compile_context>

<pallas_src>
import functools

import jax
import jax.numpy as jnp
from jax.experimental import pallas as pl
from jax.experimental.pallas import tpu as pltpu


def _crop_kernel(x_ref, o_ref, *, h0, w0):
    """Copy the (static) crop window of the fetched block to the output.

    When the BlockSpec already restricted the DMA to the crop window, h0 == 0,
    w0 == 0 and the fetched block equals the output block, so the slice below
    is the full block (a pure copy, no relayout work).
    """
    ch = o_ref.shape[1]
    cw = o_ref.shape[2]
    o_ref[...] = x_ref[:, h0:h0 + ch, w0:w0 + cw]


def _pallas_crop(x3, crop_h, crop_w, top, left, use_window_dma,
                 target_block_bytes):
    """Run the crop over a (N, H, W) array with Pallas."""
    N, H, W = x3.shape

    if use_window_dma:
        # --- H (sublane) axis: express the crop window in the BlockSpec when
        # it is tiling-legal (multiple of 8 sublanes), so only crop_h rows are
        # DMA'd from HBM; otherwise fetch the full axis and slice in-kernel.
        if top == 0 and crop_h == H:
            h_dim, h_map, h0, fetch_h = H, 0, 0, H
        elif crop_h % 8 == 0:
            h_dim, h_map, h0, fetch_h = pl.Element(crop_h), top, 0, crop_h
        else:
            h_dim, h_map, h0, fetch_h = H, 0, top, H
        # --- W (lane) axis: same idea with the 128-lane constraint.
        if left == 0 and crop_w == W:
            w_dim, w_map, w0, fetch_w = W, 0, 0, W
        elif crop_w % 128 == 0:
            w_dim, w_map, w0, fetch_w = pl.Element(crop_w), left, 0, crop_w
        else:
            w_dim, w_map, w0, fetch_w = W, 0, left, W
    else:
        # Conservative path: full-axis fetch, static slice inside the kernel.
        h_dim, h_map, h0, fetch_h = H, 0, top, H
        w_dim, w_map, w0, fetch_w = W, 0, left, W

    # --- Tile the collapsed (B*C) axis with large blocks (amortize the
    # ~0.35us/step grid overhead), keep >= 2 blocks when possible for v7x's
    # two TensorCores.  Blocks stay far below VMEM limits on every generation
    # (<= ~1 MiB input + output, double buffered).
    itemsize = x3.dtype.itemsize
    per_image_in_bytes = max(fetch_h * fetch_w * itemsize, 1)
    tile_n = max(1, min(N, target_block_bytes // per_image_in_bytes))
    if N > 1:
        tile_n = min(tile_n, pl.cdiv(N, 2))
    grid = (pl.cdiv(N, tile_n),)

    kernel = functools.partial(_crop_kernel, h0=h0, w0=w0)

    in_bytes = N * fetch_h * fetch_w * itemsize
    out_bytes = N * crop_h * crop_w * itemsize

    return pl.pallas_call(
        kernel,
        out_shape=jax.ShapeDtypeStruct((N, crop_h, crop_w), x3.dtype),
        grid=grid,
        in_specs=[
            pl.BlockSpec((tile_n, h_dim, w_dim),
                         lambda n: (n, h_map, w_map)),
        ],
        out_specs=pl.BlockSpec((tile_n, crop_h, crop_w),
                               lambda n: (n, 0, 0)),
        compiler_params=pltpu.CompilerParams(
            dimension_semantics=("parallel",),
        ),
        cost_estimate=pl.CostEstimate(
            flops=0, transcendentals=0, bytes_accessed=in_bytes + out_bytes
        ),
    )(x3)


def center_crop_pallas(x, crop_size, *, target_block_bytes=1 << 20):
    """torchvision.transforms.CenterCrop semantics on the last two dims.

    x: (B, C, H, W) array.  crop_size: (crop_h, crop_w).
    If the input is smaller than the crop, zero-pad (torchvision behavior) --
    the padding is glue and done in plain JAX; the crop copy runs in Pallas.
    """
    crop_h, crop_w = crop_size
    B, C, H, W = x.shape

    # torchvision pads symmetrically (extra pixel on the right/bottom) when the
    # image is smaller than the requested crop.
    if H < crop_h or W < crop_w:
        pad_t = max((crop_h - H) // 2, 0)
        pad_b = max(crop_h - H - pad_t, 0)
        pad_l = max((crop_w - W) // 2, 0)
        pad_r = max(crop_w - W - pad_l, 0)
        x = jnp.pad(x, ((0, 0), (0, 0), (pad_t, pad_b), (pad_l, pad_r)))
        B, C, H, W = x.shape

    # torchvision: crop_top = int(round((H - crop_h) / 2.0)), same for left.
    top = int(round((H - crop_h) / 2.0))
    left = int(round((W - crop_w) / 2.0))

    # Collapse batch and channel: the crop is identical for every (b, c) image.
    x3 = x.reshape(B * C, H, W)

    try:
        out3 = _pallas_crop(x3, crop_h, crop_w, top, left,
                            use_window_dma=True,
                            target_block_bytes=target_block_bytes)
    except Exception:
        # Robustness guard: if this JAX/Mosaic build rejects the
        # pl.Element crop-window BlockSpec, fall back to the conservative
        # full-axis fetch + static in-kernel slice (known-good lowering).
        out3 = _pallas_crop(x3, crop_h, crop_w, top, left,
                            use_window_dma=False,
                            target_block_bytes=target_block_bytes)

    return out3.reshape(B, C, crop_h, crop_w)


def center_crop_reference(x, crop_size):
    """Pure-JAX reference replicating torchvision CenterCrop."""
    crop_h, crop_w = crop_size
    B, C, H, W = x.shape
    if H < crop_h or W < crop_w:
        pad_t = max((crop_h - H) // 2, 0)
        pad_b = max(crop_h - H - pad_t, 0)
        pad_l = max((crop_w - W) // 2, 0)
        pad_r = max(crop_w - W - pad_l, 0)
        x = jnp.pad(x, ((0, 0), (0, 0), (pad_t, pad_b), (pad_l, pad_r)))
        B, C, H, W = x.shape
    top = int(round((H - crop_h) / 2.0))
    left = int(round((W - crop_w) / 2.0))
    return x[:, :, top:top + crop_h, left:left + crop_w]


class MyCropPallas:
    """Mirror of the PyTorch MyCrop module (no learnable parameters)."""

    def __init__(self, input_kind: str, feat_seq_len: int):
        if input_kind == "AUDIO":
            self.crop_size = (feat_seq_len, 1)
        elif input_kind == "MFCC":
            self.crop_size = (feat_seq_len, 40)
        elif input_kind == "MFCC_EXT":
            self.crop_size = (feat_seq_len, 120)
        elif input_kind == "XLSR":
            self.crop_size = (feat_seq_len, 1024)
        else:
            raise ValueError(input_kind)

    def __call__(self, x):
        return center_crop_pallas(x, self.crop_size)


if __name__ == "__main__":
    key = jax.random.PRNGKey(0)

    # Shapes consistent with Input.MFCC: (B, C, T, F) = (2, 1, 16, 40),
    # feat_seq_len = 8  -> output (2, 1, 8, 40).
    B, C, T, F = 2, 1, 16, 40
    feat_seq_len = 8
    x = jax.random.normal(key, (B, C, T, F), dtype=jnp.float32)

    module = MyCropPallas("MFCC", feat_seq_len)
    out = jax.block_until_ready(module(x))

    ref = center_crop_reference(x, module.crop_size)
    assert out.shape == (B, C, feat_seq_len, F), out.shape
    assert jnp.array_equal(out, ref), "Pallas center-crop mismatch vs reference"

    print("KERNEL_OK")
</pallas_src>

<mosaic_0001>
module attributes {stable_mosaic.version = 11 : i64} {
  func.func @_crop_kernel(%arg0: i32, %arg1: memref<1x16x40xf32, #tpu.memory_space<vmem>>, %arg2: memref<1x8x40xf32, #tpu.memory_space<vmem>>) attributes {dimension_semantics = [#tpu.dimension_semantics<parallel>], iteration_bounds = array<i64: 2>, scalar_prefetch = 0 : i64, scratch_operands = 0 : i64, tpu.core_type = #tpu.core_type<tc>, window_params = [{transform_indices = @transform_0, window_bounds = array<i64: 1, 16, 40>}, {transform_indices = @transform_1, window_bounds = array<i64: 1, 8, 40>}]} {
    %c0 = arith.constant 0 : index
    %c4 = arith.constant 4 : index
    %c0_0 = arith.constant 0 : index
    %0 = vector.load %arg1[%c0, %c4, %c0_0] : memref<1x16x40xf32, #tpu.memory_space<vmem>>, vector<1x8x40xf32>
    %c0_1 = arith.constant 0 : index
    %c0_2 = arith.constant 0 : index
    %c0_3 = arith.constant 0 : index
    %1 = vector.load %arg2[%c0_1, %c0_2, %c0_3] : memref<1x8x40xf32, #tpu.memory_space<vmem>>, vector<1x8x40xf32>
    tpu.vector_store %arg2[%c0_1, %c0_2, %c0_3], %0 {strides = array<i32>} : memref<1x8x40xf32, #tpu.memory_space<vmem>>, vector<1x8x40xf32>,
    return
  }
  func.func @transform_0(%arg0: i32) -> (i32, i32, i32) {
    %c0_i32 = arith.constant 0 : i32
    %c0_i32_0 = arith.constant 0 : i32
    %c0_i32_1 = arith.constant 0 : i32
    return %arg0, %c0_i32, %c0_i32_0 : i32, i32, i32
  }
  func.func @transform_1(%arg0: i32) -> (i32, i32, i32) {
    %c0_i32 = arith.constant 0 : i32
    %c0_i32_0 = arith.constant 0 : i32
    %c0_i32_1 = arith.constant 0 : i32
    return %arg0, %c0_i32, %c0_i32_0 : i32, i32, i32
  }
}

</mosaic_0001>

<bundles_post_ra>
// kernel: tpu_custom_call.1
= control target key start
LH: loop header
LB: loop body
LE: loop exit
PB: predicated region body
PF: predicated region fallthrough
CT: control target
= control target key end

     0   :  { %6 = vsyncpa [#allocation3], 0  ;;  %s557_s0 = inlined_call_operand.hbm [shape: f32[2,16,40], index: 0, kind: input, shape index: {}]   ;;  %s558_s1 = inlined_call_operand.hbm [shape: f32[2,8,40], index: 1, kind: output, shape index: {}]  }
   0x1   :  { %8 = vsyncpa [#allocation3 + $0x1], 0 }
   0x2   :  { %9 = vsyncpa [#allocation4], 0 }
   0x3   :  { %11 = vsyncpa [#allocation4 + $0x1], 0  ;;  %s396_s6 = smov 0   ;;  %s398_s7 = smov 0  }
   0x4   :  { %s400_s8 = smov 0   ;;  %s402_s9 = smov 0  }
   0x5 LB: > { %s417_s10 = sadd.s32 4294967295, %s380_s9   ;;  %s222_s11 = sadd.s32 4294967294, %s380_s9   ;;  %s380_s9 = sphi %s402_s9, %s571_s9   ;;  %s376_s8 = sphi %s400_s8, %s570_s8   ;;  %s372_s7 = sphi %s398_s7, %s569_s7   ;;  %s368_s6 = sphi %s396_s6, %s568_s6  }
   0x6   : > { %s421_s12 = sadd.s32 1, %s380_s9   ;;  %s24_s13 = sadd.s32 1, %s376_s8 }
   0x7   : > { %s21_s14 = ssub.s32 %s380_s9, %s421_s12  ;;  %p31_p0 = scmp.ne.s32.totalorder %s376_s8, %s372_s7 }
   0x8   : > { %p22_p1 = scmp.eq.s32.totalorder %s21_s14, 0  ;;  %p32_p2 = scmp.eq.s32.totalorder %s380_s9, 0 }
   0x9   : > { %p37_p3 = scmp.ne.s32.totalorder %s372_s7, %s368_s6  ;;  %p38_p4 = scmp.eq.s32.totalorder %s417_s10, 0 }
   0xa   : > { %s433_s15 = scalar_select %p22_p1, %s376_s8, %s24_s13  }
   0xb   : > { %p435_p5 = por %p32_p2, %p31_p0  ;;  %p439_p6 = por %p38_p4, %p37_p3 }
   0xc   : > { %p61_p7 = scmp.eq.s32.totalorder %s417_s10, 1  ;;  %p67_p8 = scmp.eq.s32.totalorder %s222_s11, 1 }
   0xd   : > { %p248_p10 = scmp.lt.s32.totalorder %s380_s9, 2  ;;  %s87_s20 = sand.u32 1, %s376_s8  }
   0xe   : > { %p446_p11 = por %p61_p7, %p31_p0  ;;  %p450_p12 = por %p67_p8, %p37_p3 }
   0xf   : > { %s235_s21 = sshll.u32 %s380_s9, 8  ;;  %s225_s22 = sshll.u32 %s87_s20, 4 }
  0x10   : > { %s562_s18 = scalar_select %p446_p11, 1, 0 }
  0x11   : > { %s563_s19 = scalar_select %p450_p12, 1, 0 }
  0x12   : > { %s459_s25 = scalar_lea.hbm %s557_s0, %s235_s21  ;;  %s91_s26 = scalar_lea.vmem [#allocation2], %s225_s22 }
  0x13   : > { %s98_s27 = sshll.u32 %s91_s26, 4  ;;  %p463_p13 = pnand %p248_p10, %p435_p5  ;;  %s467_s27 = int_to_ptr.vmem [resolvable:$true] %s98_s27 }
  0x14   : > { %s469_s29 = scalar_lea.sflag [#allocation3], %s87_s20  ;;  %s284_s30 = scalar_lea.hbm %s459_s25, 256 }
  0x15   : > { %p285_p0 = scmp.ne.s32.totalorder %s459_s25, %s284_s30  ;;  %p286_p1 = pneg %p463_p13 }
  0x16   : > { %s289_s4 = scalar_lea.hbm %s557_s0, 512  ;;  %p290_p4 = scmp.lt.u32.totalorder %s459_s25, %s557_s0 }
  0x17   : > { %p287_p2 = pnand %p286_p1, %p285_p0  ;;  %p291_p5 = scmp.lt.u32.totalorder %s289_s4, %s284_s30 }
  0x18   : > { %p293_p8 = scmp.lt.u32.totalorder %s284_s30, %s459_s25 }
  0x19   : > { %p288_p3 = pneg %p287_p2  ;;  %p292_p7 = por %p291_p5, %p290_p4 }
  0x1b   : > { %p294_p10 = por %p293_p8, %p292_p7 }
  0x1d   : > { %p295_p9 = pnand %p294_p10, %p288_p3 }
  0x1f   : > { %298 = shalt.err (!%p295_p9)
}
  0x20   : > { %s299_s13 = scalar_lea.vmem %s467_s27, 256  ;;  %s382_s14 = smov [#allocation2]  }
  0x21   : > { %p300_p0 = scmp.ne.s32.totalorder %s467_s27, %s299_s13  ;;  %s304_s16 = sshll.u32 %s382_s14, 4  ;;  %s305_s16 = int_to_ptr.vmem [resolvable:$false] %s304_s16 }
  0x22   : > { %s306_s20 = scalar_lea.vmem %s305_s16, 512  ;;  %p307_p11 = scmp.lt.s32.totalorder %s467_s27, %s305_s16 }
  0x23   : > { %p302_p2 = pnand %p300_p0, %p286_p1  ;;  %p308_p4 = scmp.lt.s32.totalorder %s306_s20, %s299_s13 }
  0x25   : > { %p303_p12 = pneg %p302_p2  ;;  %p309_p5 = por %p308_p4, %p307_p11 }
  0x27   : > { %p310_p7 = pnand %p309_p5, %p303_p12 }
  0x29   : > { %313 = shalt.err (!%p310_p7)
}
  0x2a   : > { %s383_s21 = smov 128   ;;  %s384_s22 = smov 8  }
  0x2b   : > { %243 = dma.hbm_to_vmem [thread:$0]  (!%p463_p13), %s459_s25, 256, %s467_s27, %s469_s29, %s383_s21, %s383_s21, %s384_s22  }
  0x2c   : > { %p228_p9 = scmp.ge.s32.totalorder %s380_s9, 1  ;;  %p106_p1 = scmp.lt.s32.totalorder %s380_s9, 3 }
  0x2e   : > { %p107_p3 = pnand %p228_p9, %p106_p1 }
  0x2f   : > { %s500_s23 = sand.u32 (!%p107_p3), 1, %s372_s7  }
  0x30   : > { %110 = sbr.rel (%p107_p3) target bundleno = 82 (0x52), region = 24  ;;  %s229_s24 = sshll.u32 (!%p107_p3), %s500_s23, 4 }
  0x31   : > { %s113_s26 = scalar_lea.sflag (!%p107_p3), [#allocation3], %s500_s23  ;;  %s116_s30 = scalar_lea.vmem (!%p107_p3), [#allocation2], %s229_s24 }
  0x37   : > { %359 = dma.done.wait (%p439_p6), %s113_s26, 256  }
  0x38   : > { %361 = vsyncadd (%p439_p6), %s113_s26, 4294967040  ;;  %s230_s25 = sshll.u32 %s500_s23, 3  ;;  %s232_s29 = sshll.u32 %s417_s10, 7  ;;  %vm136_vm0 = vcmask 326656   ;;  %v135_v0 = vld [vmem:[%s116_s30 + $0x4] sm:$0xff] }
  0x39   : > { %s134_s27 = scalar_lea.vmem [#allocation5], %s230_s25  ;;  %s515_s4 = scalar_lea.hbm %s558_s1, %s232_s29 }
  0x3a   : > { %s152_s28 = sshll.u32 %s134_s27, 4  ;;  %137 = vst.msk [vmem:[%s134_s27] sm:$0xff] %vm136_vm0, %v135_v0  ;;  %s139_s17 = scalar_lea.sflag [#allocation4], %s500_s23  ;;  %s510_s28 = int_to_ptr.vmem [resolvable:$true] %s152_s28 }
  0x3b   : > { %s314_s5 = scalar_lea.vmem %s510_s28, 128  ;;  %p565_p11 = scmp.ne.s32.totalorder %s562_s18, 0 }
  0x3c   : > { %p315_p6 = scmp.ne.s32.totalorder %s510_s28, %s314_s5  ;;  %s385_s10 = smov [#allocation5]  }
  0x3d   : > { %s318_s11 = sshll.u32 %s385_s10, 4  ;;  %s319_s11 = int_to_ptr.vmem [resolvable:$false] %s318_s11 }
  0x3e   : > { %p316_p12 = pnand %p315_p6, %p565_p11  ;;  %s320_s13 = scalar_lea.vmem %s319_s11, 256 }
  0x3f   : > { %p321_p8 = scmp.lt.s32.totalorder %s510_s28, %s319_s11  ;;  %p322_p10 = scmp.lt.s32.totalorder %s320_s13, %s314_s5 }
  0x40   : > { %p317_p13 = pneg %p316_p12 }
  0x41   : > { %p323_p0 = por %p322_p10, %p321_p8 }
  0x43   : > { %p324_p2 = pnand %p323_p0, %p317_p13 }
  0x45   : > { %327 = shalt.err (!%p324_p2)
}
  0x46   : > { %s328_s14 = scalar_lea.hbm %s515_s4, 128  ;;  %s332_s21 = scalar_lea.hbm %s558_s1, 256 }
  0x47   : > { %p329_p4 = scmp.ne.s32.totalorder %s515_s4, %s328_s14  ;;  %p333_p9 = scmp.lt.u32.totalorder %s515_s4, %s558_s1 }
  0x48   : > { %p334_p1 = scmp.lt.u32.totalorder %s332_s21, %s328_s14  ;;  %p336_p6 = scmp.lt.u32.totalorder %s328_s14, %s515_s4 }
  0x49   : > { %p330_p5 = pnand %p329_p4, %p565_p11 }
  0x4a   : > { %p335_p3 = por %p334_p1, %p333_p9 }
  0x4b   : > { %p331_p7 = pneg %p330_p5 }
  0x4c   : > { %p337_p12 = por %p336_p6, %p335_p3 }
  0x4e   : > { %p338_p13 = pnand %p337_p12, %p331_p7 }
  0x50   : > { %341 = shalt.err (!%p338_p13)
}
  0x51   : > { %238 = dma.vmem_to_hbm [thread:$0]  (%p565_p11), %s510_s28, 128, %s515_s4, %s139_s17  }
  0x52 PF: > { %s164_s24 = sand.u32 1, %s368_s6   ;;  %p566_p8 = scmp.ne.s32.totalorder %s563_s19, 0 }
  0x53   : > { %p567_p10 = scmp.ge.s32.totalorder %s380_s9, 2  ;;  %s165_s26 = scalar_lea.sflag [#allocation4], %s164_s24 }
  0x55   : > { %p245_p0 = pnand %p567_p10, %p566_p8 }
  0x57   : > { %363 = dma.done.wait (!%p245_p0), %s165_s26, 128  }
  0x58   : > { %365 = vsyncadd (!%p245_p0), %s165_s26, 4294967168  ;;  %p14_p2 = scmp.ge.s32.totalorder %s421_s12, 4   ;;  %s568_s6 = smov %s372_s7 }
  0x59   : > { %s569_s7 = smov %s376_s8  ;;  %s570_s8 = smov %s433_s15 }
  0x5a   : > { %s571_s9 = smov %s421_s12  ;;  %16 = sbr.rel (!%p14_p2) target bundleno = 5 (0x5), region = 69 }
  0x61   :  { %170 = vsyncpa [#allocation3], 1 }
  0x62   :  { %172 = vsyncpa [#allocation3 + $0x1], 1 }
  0x63   :  { %173 = vsyncpa [#allocation4], 1 }
  0x64   :  { %175 = vsyncpa [#allocation4 + $0x1], 1 }

</bundles_post_ra>
